<compile_context>
chip_gen: v5e
topology: v5e:2x2
jax: 0.10.0
libtpu: 0.0.40
codegen_flags: <defaults>
</compile_context>

<pallas_src>
import jax
import jax.numpy as jnp
from jax.experimental import pallas as pl
from jax.experimental.pallas import tpu as pltpu

_LANE = 128
_MAX_UNROLL = 64  # cap on statically-unrolled per-block window-column copies


# --------------------------------------------------------------------------- kernels
def _make_lane_dense_kernel(cw: int, ws_c: int):
    """Lane-dense copy. x_ref: (rh, ws, cw*ws*C); o_ref: (rh, cw, ws, ws*C).

    Requires (ws*C) % 128 == 0 so every lane slice below starts 128-aligned.
    """

    def kernel(x_ref, o_ref):
        for j in range(cw):
            o_ref[:, j, :, :] = x_ref[:, :, j * ws_c:(j + 1) * ws_c]

    return kernel


def _make_tile_kernel(cw: int):
    """Tile-aligned copy. x_ref: (rh, ws, cw, ws, C); o_ref: (rh, cw, ws, ws, C).

    Each copy moves whole (ws, C) minor tiles (the full last-two dims), so it lowers to
    plain full-tile vld/vst regardless of ws / C alignment.
    """

    def kernel(x_ref, o_ref):
        for j in range(cw):
            o_ref[:, j, :, :, :] = x_ref[:, :, j, :, :]

    return kernel


# --------------------------------------------------------------------------- tiling
def _vmem_capacity_bytes() -> int:
    """Physical VMEM of the current generation; conservative (v7x) fallback."""
    try:
        info = pltpu.get_tpu_info()
        cap = getattr(info, "vmem_capacity_bytes", None)
        if cap:
            return int(cap)
    except Exception:
        pass
    return 64 << 20


def _largest_divisor_leq(n: int, cap: int) -> int:
    cap = max(1, min(n, cap))
    for d in range(cap, 0, -1):
        if n % d == 0:
            return d
    return 1


def _pick_rows_per_block(n_rows: int, row_block_bytes: int, col_steps: int,
                         block_target: int) -> int:
    """Largest divisor of n_rows fitting the block target, preferring an even, >=4
    total grid-step count (v7x 2-TC balance) and >=2 steps (DMA pipelining)."""
    divisors = [r for r in range(1, n_rows + 1) if n_rows % r == 0]
    fitting = [r for r in divisors if r * row_block_bytes <= block_target] or [1]

    def tier(r: int) -> int:
        steps = (n_rows // r) * col_steps
        if steps >= 4 and steps % 2 == 0:
            return 0
        if steps >= 2 and steps % 2 == 0:
            return 1
        if steps >= 2:
            return 2
        return 3

    best = min(tier(r) for r in fitting)
    return max(r for r in fitting if tier(r) == best)


# --------------------------------------------------------------------------- wrapper
def window_partition(x: jax.Array, window_size: int) -> jax.Array:
    """Partition (B, H, W, *embed_dims) into (B, H//ws, W//ws, ws, ws, *embed_dims)."""
    if x.ndim < 3:
        raise ValueError(f"Expected input of rank >= 3 (B, H, W, ...), got {x.shape}")
    B, H, W = x.shape[:3]
    embed_dims = x.shape[3:]
    ws = int(window_size)
    if H % ws != 0 or W % ws != 0:
        raise ValueError(
            f"H and W must be divisible by window_size {ws}. Got H={H}, W={W}.")
    nH, nW = H // ws, W // ws

    # Flatten trailing embed dims into a single channel dim C.
    C = 1
    for d in embed_dims:
        C *= int(d)
    itemsize = jnp.dtype(x.dtype).itemsize

    R = B * nH                                  # total window rows (batch merged in)
    win_bytes = ws * ws * C * itemsize          # one window
    total_bytes = B * H * W * C * itemsize

    # Generation-aware budgets.
    vmem_cap = _vmem_capacity_bytes()
    block_target = min(max(vmem_cap // 10, 2 << 20), 12 << 20)

    # Window columns per block: bounded by the unroll cap and the block target
    # (escape hatch for huge W*C where a full window row would not fit).
    cw_cap = min(nW, _MAX_UNROLL, max(1, block_target // max(win_bytes, 1)))
    cw = _largest_divisor_leq(nW, cw_cap)
    col_steps = nW // cw
    col_block_bytes = cw * win_bytes

    # Rows of windows per block.
    rh = _pick_rows_per_block(R, col_block_bytes, col_steps, block_target)
    grid = (R // rh, col_steps)

    # VMEM limit sized from the real double-buffered footprint (2 in + 2 out blocks).
    block_bytes = rh * col_block_bytes
    vmem_limit = max(16 << 20, min(4 * block_bytes + (4 << 20), vmem_cap - (2 << 20)))

    lane_dense = (ws * C) % _LANE == 0

    if lane_dense:
        # Free, contiguous reshapes on both sides; minor dims are >=128 and aligned.
        xr = x.reshape(R, ws, W * C)
        in_spec = pl.BlockSpec((rh, ws, cw * ws * C), lambda i, j: (i, 0, j))
        out_shape = jax.ShapeDtypeStruct((R, nW, ws, ws * C), x.dtype)
        out_spec = pl.BlockSpec((rh, cw, ws, ws * C), lambda i, j: (i, j, 0, 0))
        kernel = _make_lane_dense_kernel(cw, ws * C)
    else:
        # Free, contiguous reshapes; every copy is a full (ws, C) minor tile.
        xr = x.reshape(R, ws, nW, ws, C)
        in_spec = pl.BlockSpec((rh, ws, cw, ws, C), lambda i, j: (i, 0, j, 0, 0))
        out_shape = jax.ShapeDtypeStruct((R, nW, ws, ws, C), x.dtype)
        out_spec = pl.BlockSpec((rh, cw, ws, ws, C), lambda i, j: (i, j, 0, 0, 0))
        kernel = _make_tile_kernel(cw)

    out = pl.pallas_call(
        kernel,
        out_shape=out_shape,
        grid=grid,
        in_specs=[in_spec],
        out_specs=out_spec,
        compiler_params=pltpu.CompilerParams(
            dimension_semantics=("parallel", "parallel"),
            vmem_limit_bytes=int(vmem_limit),
        ),
        cost_estimate=pl.CostEstimate(
            flops=0, transcendentals=0, bytes_accessed=2 * total_bytes),
    )(xr)

    # Free reshape back to the 6-D partitioned view.
    return out.reshape(B, nH, nW, ws, ws, *embed_dims)


def window_partition_ref(x: jax.Array, window_size: int) -> jax.Array:
    """Pure-JAX reference matching the PyTorch forward exactly."""
    B, H, W = x.shape[:3]
    embed_dims = x.shape[3:]
    ws = window_size
    xr = x.reshape(B, H // ws, ws, W // ws, ws, *embed_dims)
    perm = (0, 1, 3, 2, 4) + tuple(range(5, xr.ndim))
    return jnp.transpose(xr, perm)


if __name__ == "__main__":
    key = jax.random.PRNGKey(0)
    k1, k2 = jax.random.split(key)

    # Case 1: lane-dense path (ws*C = 256, multiple of 128).
    B, H, W, C = 2, 16, 16, 32
    ws = 8
    x1 = jax.random.normal(k1, (B, H, W, C), dtype=jnp.float32)
    out1 = jax.block_until_ready(window_partition(x1, ws))
    ref1 = window_partition_ref(x1, ws)
    assert out1.shape == (B, H // ws, W // ws, ws, ws, C), out1.shape
    assert out1.dtype == x1.dtype
    assert jnp.array_equal(out1, ref1), "lane-dense path mismatch"

    # Case 2: tile-aligned path (ws=7, multi-dim embed, ws*C = 168 not a multiple of 128).
    B2, H2, W2, ws2 = 2, 14, 14, 7
    embed = (4, 6)
    x2 = jax.random.normal(k2, (B2, H2, W2) + embed, dtype=jnp.float32)
    out2 = jax.block_until_ready(window_partition(x2, ws2))
    ref2 = window_partition_ref(x2, ws2)
    assert out2.shape == (B2, H2 // ws2, W2 // ws2, ws2, ws2) + embed, out2.shape
    assert out2.dtype == x2.dtype
    assert jnp.array_equal(out2, ref2), "tile-aligned path mismatch"

    print("KERNEL_OK")
</pallas_src>

<mosaic_0001>
module attributes {stable_mosaic.version = 11 : i64} {
  func.func @kernel(%arg0: i32, %arg1: i32, %arg2: memref<1x8x512xf32, #tpu.memory_space<vmem>>, %arg3: memref<1x2x8x256xf32, #tpu.memory_space<vmem>>) attributes {dimension_semantics = [#tpu.dimension_semantics<parallel>, #tpu.dimension_semantics<parallel>], iteration_bounds = array<i64: 4, 1>, scalar_prefetch = 0 : i64, scratch_operands = 0 : i64, tpu.core_type = #tpu.core_type<tc>, window_params = [{transform_indices = @transform_0, window_bounds = array<i64: 1, 8, 512>}, {transform_indices = @transform_1, window_bounds = array<i64: 1, 2, 8, 256>}]} {
    %c0 = arith.constant 0 : index
    %c0_0 = arith.constant 0 : index
    %c0_1 = arith.constant 0 : index
    %0 = vector.load %arg2[%c0, %c0_0, %c0_1] : memref<1x8x512xf32, #tpu.memory_space<vmem>>, vector<1x8x256xf32>
    %c0_2 = arith.constant 0 : index
    %c0_3 = arith.constant 0 : index
    %c0_4 = arith.constant 0 : index
    %c0_5 = arith.constant 0 : index
    %1 = vector.load %arg3[%c0_2, %c0_3, %c0_4, %c0_5] : memref<1x2x8x256xf32, #tpu.memory_space<vmem>>, vector<1x1x8x256xf32>
    %2 = vector.shape_cast %1 : vector<1x1x8x256xf32> to vector<1x8x256xf32>
    %3 = vector.shape_cast %0 : vector<1x8x256xf32> to vector<1x1x8x256xf32>
    tpu.vector_store %arg3[%c0_2, %c0_3, %c0_4, %c0_5], %3 {strides = array<i32>} : memref<1x2x8x256xf32, #tpu.memory_space<vmem>>, vector<1x1x8x256xf32>,
    %c0_6 = arith.constant 0 : index
    %c0_7 = arith.constant 0 : index
    %c256 = arith.constant 256 : index
    %4 = vector.load %arg2[%c0_6, %c0_7, %c256] : memref<1x8x512xf32, #tpu.memory_space<vmem>>, vector<1x8x256xf32>
    %c0_8 = arith.constant 0 : index
    %c1 = arith.constant 1 : index
    %c0_9 = arith.constant 0 : index
    %c0_10 = arith.constant 0 : index
    %5 = vector.load %arg3[%c0_8, %c1, %c0_9, %c0_10] : memref<1x2x8x256xf32, #tpu.memory_space<vmem>>, vector<1x1x8x256xf32>
    %6 = vector.shape_cast %5 : vector<1x1x8x256xf32> to vector<1x8x256xf32>
    %7 = vector.shape_cast %4 : vector<1x8x256xf32> to vector<1x1x8x256xf32>
    tpu.vector_store %arg3[%c0_8, %c1, %c0_9, %c0_10], %7 {strides = array<i32>} : memref<1x2x8x256xf32, #tpu.memory_space<vmem>>, vector<1x1x8x256xf32>,
    return
  }
  func.func @transform_0(%arg0: i32, %arg1: i32) -> (i32, i32, i32) {
    %c0_i32 = arith.constant 0 : i32
    %c0_i32_0 = arith.constant 0 : i32
    return %arg0, %c0_i32, %arg1 : i32, i32, i32
  }
  func.func @transform_1(%arg0: i32, %arg1: i32) -> (i32, i32, i32, i32) {
    %c0_i32 = arith.constant 0 : i32
    %c0_i32_0 = arith.constant 0 : i32
    %c0_i32_1 = arith.constant 0 : i32
    return %arg0, %arg1, %c0_i32, %c0_i32_0 : i32, i32, i32, i32
  }
}

</mosaic_0001>

<bundles_post_ra>
// kernel: tpu_custom_call.1
= control target key start
LH: loop header
LB: loop body
LE: loop exit
PB: predicated region body
PF: predicated region fallthrough
CT: control target
= control target key end

     0   :  { %6 = vsyncpa [#allocation3], 0  ;;  %s597_s0 = inlined_call_operand.hbm [shape: f32[4,8,512], index: 0, kind: input, shape index: {}]   ;;  %s598_s1 = inlined_call_operand.hbm [shape: f32[4,2,8,256], index: 1, kind: output, shape index: {}]  }
   0x1   :  { %8 = vsyncpa [#allocation3 + $0x1], 0 }
   0x2   :  { %9 = vsyncpa [#allocation4], 0 }
   0x3   :  { %11 = vsyncpa [#allocation4 + $0x1], 0  ;;  %s479_s6 = smov 0   ;;  %s481_s7 = smov 0  }
   0x4   :  { %s483_s8 = smov 0   ;;  %s485_s9 = smov 0  }
   0x5   :  { %s487_s10 = smov 0   ;;  %s489_s11 = smov 0  }
   0x6 LB: > { %s270_s12 = sadd.s32 4294967295, %s465_s11   ;;  %s271_s13 = sadd.s32 4294967294, %s465_s11   ;;  %s465_s11 = sphi %s489_s11, %s17_s11   ;;  %s461_s10 = sphi %s487_s10, %s607_s10   ;;  %s457_s9 = sphi %s485_s9, %s606_s9   ;;  %s453_s8 = sphi %s483_s8, %s605_s8   ;;  %s449_s7 = sphi %s481_s7, %s604_s7   ;;  %s445_s6 = sphi %s479_s6, %s603_s6  }
   0x7   : > { %s29_s14 = sadd.s32 1, %s461_s10  ;;  %s38_s15 = sadd.s32 1, %s453_s8 }
   0x8   : > { %p31_p0 = scmp.ge.s32.totalorder %s29_s14, 4  ;;  %p45_p1 = scmp.ne.s32.totalorder %s453_s8, %s449_s7 }
   0x9   : > { %p46_p2 = scmp.eq.s32.totalorder %s465_s11, 0  ;;  %p51_p3 = scmp.ne.s32.totalorder %s449_s7, %s445_s6 }
   0xa   : > { %s609_s14 = smov (%p31_p0, %s29_s14), 0  ;;  %p52_p5 = scmp.eq.s32.totalorder %s270_s12, 0 }
   0xb   : > { %p520_p4 = por %p46_p2, %p45_p1  ;;  %s33_s17 = ssub.s32 %s461_s10, %s609_s14 }
   0xc   : > { %p77_p6 = scmp.eq.s32.totalorder %s270_s12, 3  ;;  %p36_p7 = scmp.eq.s32.totalorder %s33_s17, 0 }
   0xd   : > { %p526_p8 = por %p52_p5, %p51_p3  ;;  %p83_p10 = scmp.eq.s32.totalorder %s271_s13, 3 }
   0xe   : > { %p530_p9 = por %p77_p6, %p45_p1  ;;  %p301_p12 = scmp.lt.s32.totalorder %s465_s11, 4 }
   0xf   : > { %s535_s20 = scalar_select %p36_p7, %s453_s8, %s38_s15  }
  0x10   : > { %p537_p11 = por %p83_p10, %p51_p3  ;;  %s103_s22 = sand.u32 1, %s453_s8  }
  0x11   : > { %s274_s23 = sshll.u32 %s103_s22, 5  ;;  %s287_s24 = sshll.u32 %s461_s10, 5 }
  0x12   : > { %s114_s27 = scalar_lea.hbm %s597_s0, %s287_s24  ;;  %s107_s28 = scalar_lea.vmem [#allocation2], %s274_s23 }
  0x13   : > { %s118_s29 = sshll.u32 %s107_s28, 4  ;;  %s116_s30 = sshll.u32 %s114_s27, 4  ;;  %s119_s29 = int_to_ptr.vmem [resolvable:$true] %s118_s29  ;;  %s117_s30 = int_to_ptr.hbm [resolvable:$true] %s116_s30 }
  0x14   : > { %p294_p13 = pnand %p301_p12, %p520_p4  ;;  %p277_p0 = scmp.ge.s32.totalorder %s465_s11, 1 }
  0x15   : > { %p123_p1 = scmp.lt.s32.totalorder %s465_s11, 5  ;;  %s104_s2 = scalar_lea.sflag [#allocation3], %s103_s22 }
  0x16   : > { %296 = dma.hbm_to_vmem [thread:$0]  (!%p294_p13), %s117_s30, 512, %s119_s29, %s104_s2  }
  0x17   : > { %p124_p2 = pnand %p277_p0, %p123_p1 }
  0x18   : > { %s552_s3 = sand.u32 (!%p124_p2), 1, %s449_s7  }
  0x19   : > { %127 = sbr.rel (%p124_p2) target bundleno = 47 (0x2f), region = 24  ;;  %s278_s4 = sshll.u32 (!%p124_p2), %s552_s3, 5 }
  0x1a   : > { %s130_s5 = scalar_lea.sflag (!%p124_p2), [#allocation3], %s552_s3  ;;  %s133_s12 = scalar_lea.vmem (!%p124_p2), [#allocation2], %s278_s4 }
  0x1e   : > { %436 = dma.done.wait (%p526_p8), %s130_s5, 512  }
  0x1f   : > { %438 = vsyncadd (%p526_p8), %s130_s5, 4294966784  ;;  %s288_s13 = sshll.u32 %s457_s9, 5  ;;  %s152_s22 = scalar_lea.vmem [#allocation5], %s278_s4  ;;  %v155_v0 = vld [vmem:[%s133_s12] sm:$0xff]  ;;  %v156_v1 = vld [vmem:[%s133_s12 + $0x8] sm:$0xff] }
  0x20   : > { %s179_s17 = scalar_lea.hbm %s598_s1, %s288_s13  ;;  %s180_s23 = sshll.u32 %s152_s22, 4  ;;  %v159_v2 = vld [vmem:[%s133_s12 + $0x10] sm:$0xff]  ;;  %157 = vst [vmem:[%s152_s22] sm:$0xff] %v155_v0  ;;  %v160_v3 = vld [vmem:[%s133_s12 + $0x18] sm:$0xff]  ;;  %s181_s23 = int_to_ptr.vmem [resolvable:$true] %s180_s23 }
  0x21   : > { %s182_s24 = sshll.u32 %s179_s17, 4  ;;  %158 = vst [vmem:[%s152_s22 + $0x8] sm:$0xff] %v156_v1  ;;  %s165_s18 = scalar_lea.sflag [#allocation4], %s552_s3  ;;  %s183_s24 = int_to_ptr.hbm [resolvable:$true] %s182_s24 }
  0x22   : > { %280 = vst [vmem:[%s152_s22 + $0x10] sm:$0xff] %v159_v2  ;;  %s397_s9 = sshra.s32 %s183_s24, 4  ;;  %s403_s28 = scalar_lea.hbm %s598_s1, 128  ;;  %s398_s9 = int_to_ptr.hbm [resolvable:$true] %s397_s9 }
  0x23   : > { %281 = vst [vmem:[%s152_s22 + $0x18] sm:$0xff] %v160_v3  ;;  %s399_s25 = scalar_lea.hbm %s398_s9, 32  ;;  %p404_p6 = scmp.lt.s32.totalorder %s398_s9, %s598_s1 }
  0x24   : > { %p400_p3 = scmp.ne.s32.totalorder %s398_s9, %s399_s25  ;;  %p405_p7 = scmp.lt.s32.totalorder %s403_s28, %s399_s25 }
  0x26   : > { %p401_p4 = pnand %p400_p3, %p530_p9  ;;  %p406_p8 = por %p405_p7, %p404_p6 }
  0x28   : > { %p402_p5 = pneg %p401_p4 }
  0x2a   : > { %p407_p10 = pnand %p406_p8, %p402_p5 }
  0x2c   : > { %410 = shalt.err (!%p407_p10)
}
  0x2d   : > { %s467_s2 = smov 256   ;;  %s468_s3 = smov 16  }
  0x2e   : > { %291 = dma.vmem_to_hbm [thread:$0]  (%p530_p9), %s181_s23, 512, %s183_s24, %s165_s18, %s467_s2, %s467_s2, %s468_s3  }
  0x2f PF: > { %p302_p12 = scmp.ge.s32.totalorder %s465_s11, 2  ;;  %s197_s4 = sand.u32 1, %s445_s6  }
  0x30   : > { %s198_s5 = scalar_lea.sflag [#allocation4], %s197_s4 }
  0x31   : > { %p298_p13 = pnand %p302_p12, %p537_p11 }
  0x33   : > { %p299_p0 = pneg %p298_p13 }
  0x35   : > { %440 = dma.done.wait (%p299_p0), %s198_s5, 512  }
  0x36   : > { %442 = vsyncadd (%p299_p0), %s198_s5, 4294966784  ;;  %s17_s11 = sadd.s32 1, %s465_s11   ;;  %s603_s6 = smov %s449_s7 }
  0x37   : > { %p14_p1 = scmp.ge.s32.totalorder %s17_s11, 6   ;;  %s604_s7 = smov %s453_s8 }
  0x38   : > { %s605_s8 = smov %s535_s20  ;;  %s606_s9 = smov %s461_s10 }
  0x39   : > { %s607_s10 = smov %s609_s14  ;;  %16 = sbr.rel (!%p14_p1) target bundleno = 6 (0x6), region = 70 }
  0x3e   :  { %204 = vsyncpa [#allocation3], 1 }
  0x3f   :  { %206 = vsyncpa [#allocation3 + $0x1], 1 }
  0x40   :  { %207 = vsyncpa [#allocation4], 1 }
  0x41   :  { %209 = vsyncpa [#allocation4 + $0x1], 1 }

</bundles_post_ra>
